<compile_context>
chip_gen: v6e
topology: v6e:2x2x1
jax: 0.10.0
libtpu: 0.0.40
codegen_flags: <defaults>
</compile_context>

<pallas_src>
from functools import partial

import numpy as np
import jax
import jax.numpy as jnp
from jax.experimental import pallas as pl
from jax.experimental.pallas import tpu as pltpu


def _ycbcr_to_rgb_kernel(shift_ref, mat_ref, perm_ref, x_ref, o_ref,
                         *, w_total, mask_lanes):
    """One grid step.

    shift_ref : (3,)   f32 SMEM
    mat_ref   : (3, 3) f32 SMEM (already transposed, as in the torch module:
                out[c] = sum_k (in[k] + shift[k]) * mat[k, c])
    perm_ref  : (3*tw, 3*tw) bf16 VMEM-resident 0/1 de-interleave permutation
    x_ref     : (1, th, 3*tw) f32 interleaved YCbCr rows (free NHWC view)
    o_ref     : (1, 3, th, tw) f32 planar RGB output block
    """
    tw = o_ref.shape[3]
    x = x_ref[0]                                     # (th, 3*tw) f32, lane-dense

    if mask_lanes:
        # Last W-block is partial: zero the out-of-bounds lanes explicitly so
        # undefined padding (possibly NaN/Inf) cannot pollute valid output
        # columns through 0 * NaN in the permutation matmul.
        j = pl.program_id(2)
        lane = jax.lax.broadcasted_iota(jnp.int32, x.shape, 1)
        x = jnp.where(j * x.shape[1] + lane < 3 * w_total, x, 0.0)

    # ---- MXU de-interleave (exact). 3-way Dekker split of the f32 rows into
    # bf16 parts; each bf16 pass through the 0/1 permutation is an exact
    # selection (value * 1.0, f32 accumulate), so the f32 data is reproduced
    # (to ~2^-24 rel) in planar [Y | Cb | Cr] layout.
    p = perm_ref[...]                                # (3*tw, 3*tw) bf16, 0/1
    x_hi = x.astype(jnp.bfloat16)
    r1 = x - x_hi.astype(jnp.float32)
    x_mid = r1.astype(jnp.bfloat16)
    x_lo = (r1 - x_mid.astype(jnp.float32)).astype(jnp.bfloat16)
    planar = jnp.dot(x_hi, p, preferred_element_type=jnp.float32)
    planar = planar + jnp.dot(x_mid, p, preferred_element_type=jnp.float32)
    planar = planar + jnp.dot(x_lo, p, preferred_element_type=jnp.float32)

    y = planar[:, 0 * tw:1 * tw]                     # (th, tw) each, lane-dense
    cb = planar[:, 1 * tw:2 * tw]
    cr = planar[:, 2 * tw:3 * tw]

    # ---- VPU 3x3 mix. Hoist every SMEM scalar read once; fold the shift into
    # a per-output-channel bias (drops 3 broadcast vector adds per pixel).
    s0 = shift_ref[0]; s1 = shift_ref[1]; s2 = shift_ref[2]
    m00 = mat_ref[0, 0]; m01 = mat_ref[0, 1]; m02 = mat_ref[0, 2]
    m10 = mat_ref[1, 0]; m11 = mat_ref[1, 1]; m12 = mat_ref[1, 2]
    m20 = mat_ref[2, 0]; m21 = mat_ref[2, 1]; m22 = mat_ref[2, 2]
    b0 = s0 * m00 + s1 * m10 + s2 * m20
    b1 = s0 * m01 + s1 * m11 + s2 * m21
    b2 = s0 * m02 + s1 * m12 + s2 * m22

    o_ref[0, 0] = y * m00 + cb * m10 + cr * m20 + b0
    o_ref[0, 1] = y * m01 + cb * m11 + cr * m21 + b1
    o_ref[0, 2] = y * m02 + cb * m12 + cr * m22 + b2


def _deinterleave_perm(tw):
    """(3*tw, 3*tw) 0/1 matrix mapping interleaved lane 3*v+ch -> planar lane
    ch*tw+v.  Exact in bf16."""
    p = np.zeros((3 * tw, 3 * tw), dtype=np.float32)
    v = np.arange(tw)
    for ch in range(3):
        p[3 * v + ch, ch * tw + v] = 1.0
    return jnp.asarray(p, dtype=jnp.bfloat16)


def _pick_tiles(B, H, W):
    """Lane tile tw (fixed 128 to keep the 384x384 permutation matmul cheap)
    and row tile th (as large as a conservative VMEM budget allows, while
    keeping >= ~4 grid blocks so both v7x TensorCores get work)."""
    tw = 128 if W >= 128 else W
    w_blocks = pl.cdiv(W, tw)

    # Conservative per-row VMEM bytes: double-buffered in+out pipeline blocks
    # (~48*tw) plus in-kernel f32/bf16 temporaries (split parts, planar, ...).
    bytes_per_row = 128 * tw
    budget = 12 * 1024 * 1024            # fits v5e's 16 MiB default scoped VMEM
    th_vmem = max(8, (budget // bytes_per_row) // 8 * 8)

    needed_h_blocks = -(-4 // max(1, B * w_blocks))          # ceil(4 / ...)
    th_par = max(8, ((-(-H // needed_h_blocks)) + 7) // 8 * 8)

    th = min(th_vmem, th_par)
    if th >= H:
        th = H                           # full extent is always a legal block
    return th, tw, w_blocks


def ycbcr_to_rgb_jpeg(image, shift, matrix):
    """image: (B, H, W, 3) f32 YCbCr -> (B, 3, H, W) f32 RGB (module forward)."""
    B, H, W, C = image.shape
    assert C == 3
    # Free reshape (contiguous collapse of the last two dims): lane-dense
    # interleaved rows, no extra HBM pass, no XLA transpose.
    x = image.reshape(B, H, W * 3)

    th, tw, w_blocks = _pick_tiles(B, H, W)
    h_blocks = pl.cdiv(H, th)
    grid = (B, h_blocks, w_blocks)
    perm = _deinterleave_perm(tw)        # compile-time constant (288 KiB @ tw=128)

    kernel = partial(_ycbcr_to_rgb_kernel,
                     w_total=W, mask_lanes=(W % tw != 0))

    in_specs = [
        pl.BlockSpec(memory_space=pltpu.MemorySpace.SMEM),          # shift (3,)
        pl.BlockSpec(memory_space=pltpu.MemorySpace.SMEM),          # matrix (3,3)
        pl.BlockSpec((3 * tw, 3 * tw), lambda b, i, j: (0, 0)),     # perm, VMEM resident
        pl.BlockSpec((1, th, 3 * tw), lambda b, i, j: (b, i, j)),   # interleaved rows
    ]
    out_specs = pl.BlockSpec((1, 3, th, tw), lambda b, i, j: (b, 0, i, j))

    # 3 bf16 MXU passes: 2 * 3tw MACs per input element * 3 elements/px, plus
    # ~36 VPU flops/px for the split + mix.
    flops_per_px = 54 * tw + 36
    return pl.pallas_call(
        kernel,
        out_shape=jax.ShapeDtypeStruct((B, 3, H, W), image.dtype),
        grid=grid,
        in_specs=in_specs,
        out_specs=out_specs,
        compiler_params=pltpu.CompilerParams(
            dimension_semantics=("parallel", "parallel", "parallel")),
        cost_estimate=pl.CostEstimate(
            flops=int(flops_per_px) * B * H * W,
            transcendentals=0,
            bytes_accessed=2 * B * H * W * 3 * 4 + (3 * tw) * (3 * tw) * 2),
    )(shift, matrix, perm, x)


def _make_params():
    # Deterministic parameter init, exactly as in the PyTorch __init__.
    matrix = np.array([[1.0, 0.0, 1.402],
                       [1.0, -0.344136, -0.714136],
                       [1.0, 1.772, 0.0]], dtype=np.float32).T
    shift = np.array([0.0, -128.0, -128.0], dtype=np.float32)
    return jnp.asarray(shift), jnp.asarray(matrix)


def _reference_np(image, shift, matrix):
    # Pure-numpy (float64) reference of the torch forward: tensordot + permute.
    img = np.asarray(image, dtype=np.float64)
    res = np.tensordot(img + np.asarray(shift, np.float64),
                       np.asarray(matrix, np.float64), axes=1)
    return np.transpose(res, (0, 3, 1, 2))


if __name__ == "__main__":
    shift, matrix = _make_params()
    fwd = jax.jit(ycbcr_to_rgb_jpeg)

    key = jax.random.PRNGKey(0)
    # Small spec shape, a square 128-aligned shape (exercises row tiling /
    # multi-block parallel grid), and a wide 128-aligned shape (exercises the
    # W-blocked MXU de-interleave path).
    for (B, H, W) in [(2, 16, 16), (1, 128, 128), (2, 48, 640)]:
        key, sub = jax.random.split(key)
        image = jax.random.uniform(sub, (B, H, W, 3), jnp.float32, 0.0, 255.0)
        out = jax.block_until_ready(fwd(image, shift, matrix))
        ref = _reference_np(image, shift, matrix)
        assert out.shape == (B, 3, H, W), out.shape
        np.testing.assert_allclose(np.asarray(out), ref, rtol=1e-5, atol=1e-3)

    print("KERNEL_OK")
</pallas_src>

<mosaic_0001>
module attributes {stable_mosaic.version = 11 : i64} {
  func.func @_ycbcr_to_rgb_kernel(%arg0: i32, %arg1: i32, %arg2: i32, %arg3: memref<3xf32, #tpu.memory_space<smem>>, %arg4: memref<3x3xf32, #tpu.memory_space<smem>>, %arg5: memref<48x48xbf16, #tpu.memory_space<vmem>>, %arg6: memref<1x8x48xf32, #tpu.memory_space<vmem>>, %arg7: memref<1x3x8x16xf32, #tpu.memory_space<vmem>>) attributes {dimension_semantics = [#tpu.dimension_semantics<parallel>, #tpu.dimension_semantics<parallel>, #tpu.dimension_semantics<parallel>], iteration_bounds = array<i64: 2, 2, 1>, scalar_prefetch = 0 : i64, scratch_operands = 0 : i64, tpu.core_type = #tpu.core_type<tc>, window_params = [{transform_indices = @transform_0, window_bounds = array<i64: 3>}, {transform_indices = @transform_1, window_bounds = array<i64: 3, 3>}, {pipeline_mode = #tpu.pipeline_mode<synchronous>, transform_indices = @transform_2, window_bounds = array<i64: 48, 48>}, {transform_indices = @transform_3, window_bounds = array<i64: 1, 8, 48>}, {transform_indices = @transform_4, window_bounds = array<i64: 1, 3, 8, 16>}]} {
    %c0 = arith.constant 0 : index
    %c0_0 = arith.constant 0 : index
    %c0_1 = arith.constant 0 : index
    %0 = vector.load %arg6[%c0, %c0_0, %c0_1] : memref<1x8x48xf32, #tpu.memory_space<vmem>>, vector<1x8x48xf32>
    %1 = vector.shape_cast %0 : vector<1x8x48xf32> to vector<8x48xf32>
    %c0_2 = arith.constant 0 : index
    %c0_3 = arith.constant 0 : index
    %2 = vector.load %arg5[%c0_2, %c0_3] : memref<48x48xbf16, #tpu.memory_space<vmem>>, vector<48x48xbf16>
    %3 = arith.truncf %1 : vector<8x48xf32> to vector<8x48xbf16>
    %4 = arith.extf %3 : vector<8x48xbf16> to vector<8x48xf32>
    %5 = arith.subf %1, %4 : vector<8x48xf32>
    %6 = arith.truncf %5 : vector<8x48xf32> to vector<8x48xbf16>
    %7 = arith.extf %6 : vector<8x48xbf16> to vector<8x48xf32>
    %8 = arith.subf %5, %7 : vector<8x48xf32>
    %9 = arith.truncf %8 : vector<8x48xf32> to vector<8x48xbf16>
    %cst = arith.constant dense<0.000000e+00> : vector<8x48xf32>
    %10 = tpu.matmul %3, %2, %cst {dimension_numbers = #tpu.dot_dimension_numbers<[1], [0], [0], [1], [0, 0, 1, 1], [], []>} : vector<8x48xbf16>, vector<48x48xbf16>, vector<8x48xf32> -> vector<8x48xf32>
    %cst_4 = arith.constant dense<0.000000e+00> : vector<8x48xf32>
    %11 = tpu.matmul %6, %2, %cst_4 {dimension_numbers = #tpu.dot_dimension_numbers<[1], [0], [0], [1], [0, 0, 1, 1], [], []>} : vector<8x48xbf16>, vector<48x48xbf16>, vector<8x48xf32> -> vector<8x48xf32>
    %12 = arith.addf %10, %11 : vector<8x48xf32>
    %cst_5 = arith.constant dense<0.000000e+00> : vector<8x48xf32>
    %13 = tpu.matmul %9, %2, %cst_5 {dimension_numbers = #tpu.dot_dimension_numbers<[1], [0], [0], [1], [0, 0, 1, 1], [], []>} : vector<8x48xbf16>, vector<48x48xbf16>, vector<8x48xf32> -> vector<8x48xf32>
    %14 = arith.addf %12, %13 : vector<8x48xf32>
    %15 = vector.extract_strided_slice %14 {offsets = [0, 0], sizes = [8, 16], strides = [1, 1]} : vector<8x48xf32> to vector<8x16xf32>
    %16 = vector.extract_strided_slice %14 {offsets = [0, 16], sizes = [8, 16], strides = [1, 1]} : vector<8x48xf32> to vector<8x16xf32>
    %17 = vector.extract_strided_slice %14 {offsets = [0, 32], sizes = [8, 16], strides = [1, 1]} : vector<8x48xf32> to vector<8x16xf32>
    %c0_6 = arith.constant 0 : index
    %18 = memref.load %arg3[%c0_6] : memref<3xf32, #tpu.memory_space<smem>>
    %c1 = arith.constant 1 : index
    %19 = memref.load %arg3[%c1] : memref<3xf32, #tpu.memory_space<smem>>
    %c2 = arith.constant 2 : index
    %20 = memref.load %arg3[%c2] : memref<3xf32, #tpu.memory_space<smem>>
    %c0_7 = arith.constant 0 : index
    %c0_8 = arith.constant 0 : index
    %21 = memref.load %arg4[%c0_7, %c0_8] : memref<3x3xf32, #tpu.memory_space<smem>>
    %c0_9 = arith.constant 0 : index
    %c1_10 = arith.constant 1 : index
    %22 = memref.load %arg4[%c0_9, %c1_10] : memref<3x3xf32, #tpu.memory_space<smem>>
    %c0_11 = arith.constant 0 : index
    %c2_12 = arith.constant 2 : index
    %23 = memref.load %arg4[%c0_11, %c2_12] : memref<3x3xf32, #tpu.memory_space<smem>>
    %c1_13 = arith.constant 1 : index
    %c0_14 = arith.constant 0 : index
    %24 = memref.load %arg4[%c1_13, %c0_14] : memref<3x3xf32, #tpu.memory_space<smem>>
    %c1_15 = arith.constant 1 : index
    %c1_16 = arith.constant 1 : index
    %25 = memref.load %arg4[%c1_15, %c1_16] : memref<3x3xf32, #tpu.memory_space<smem>>
    %c1_17 = arith.constant 1 : index
    %c2_18 = arith.constant 2 : index
    %26 = memref.load %arg4[%c1_17, %c2_18] : memref<3x3xf32, #tpu.memory_space<smem>>
    %c2_19 = arith.constant 2 : index
    %c0_20 = arith.constant 0 : index
    %27 = memref.load %arg4[%c2_19, %c0_20] : memref<3x3xf32, #tpu.memory_space<smem>>
    %c2_21 = arith.constant 2 : index
    %c1_22 = arith.constant 1 : index
    %28 = memref.load %arg4[%c2_21, %c1_22] : memref<3x3xf32, #tpu.memory_space<smem>>
    %c2_23 = arith.constant 2 : index
    %c2_24 = arith.constant 2 : index
    %29 = memref.load %arg4[%c2_23, %c2_24] : memref<3x3xf32, #tpu.memory_space<smem>>
    %30 = arith.mulf %18, %21 : f32
    %31 = arith.mulf %19, %24 : f32
    %32 = arith.addf %30, %31 : f32
    %33 = arith.mulf %20, %27 : f32
    %34 = arith.addf %32, %33 : f32
    %35 = arith.mulf %18, %22 : f32
    %36 = arith.mulf %19, %25 : f32
    %37 = arith.addf %35, %36 : f32
    %38 = arith.mulf %20, %28 : f32
    %39 = arith.addf %37, %38 : f32
    %40 = arith.mulf %18, %23 : f32
    %41 = arith.mulf %19, %26 : f32
    %42 = arith.addf %40, %41 : f32
    %43 = arith.mulf %20, %29 : f32
    %44 = arith.addf %42, %43 : f32
    %45 = vector.broadcast %21 : f32 to vector<8x16xf32>
    %46 = arith.mulf %15, %45 : vector<8x16xf32>
    %47 = vector.broadcast %24 : f32 to vector<8x16xf32>
    %48 = arith.mulf %16, %47 : vector<8x16xf32>
    %49 = arith.addf %46, %48 : vector<8x16xf32>
    %50 = vector.broadcast %27 : f32 to vector<8x16xf32>
    %51 = arith.mulf %17, %50 : vector<8x16xf32>
    %52 = arith.addf %49, %51 : vector<8x16xf32>
    %53 = vector.broadcast %34 : f32 to vector<8x16xf32>
    %54 = arith.addf %52, %53 : vector<8x16xf32>
    %c0_25 = arith.constant 0 : index
    %c0_26 = arith.constant 0 : index
    %c0_27 = arith.constant 0 : index
    %c0_28 = arith.constant 0 : index
    %55 = vector.load %arg7[%c0_25, %c0_26, %c0_27, %c0_28] : memref<1x3x8x16xf32, #tpu.memory_space<vmem>>, vector<1x1x8x16xf32>
    %56 = vector.shape_cast %55 : vector<1x1x8x16xf32> to vector<8x16xf32>
    %57 = vector.shape_cast %54 : vector<8x16xf32> to vector<1x1x8x16xf32>
    tpu.vector_store %arg7[%c0_25, %c0_26, %c0_27, %c0_28], %57 {strides = array<i32>} : memref<1x3x8x16xf32, #tpu.memory_space<vmem>>, vector<1x1x8x16xf32>,
    %58 = vector.broadcast %22 : f32 to vector<8x16xf32>
    %59 = arith.mulf %15, %58 : vector<8x16xf32>
    %60 = vector.broadcast %25 : f32 to vector<8x16xf32>
    %61 = arith.mulf %16, %60 : vector<8x16xf32>
    %62 = arith.addf %59, %61 : vector<8x16xf32>
    %63 = vector.broadcast %28 : f32 to vector<8x16xf32>
    %64 = arith.mulf %17, %63 : vector<8x16xf32>
    %65 = arith.addf %62, %64 : vector<8x16xf32>
    %66 = vector.broadcast %39 : f32 to vector<8x16xf32>
    %67 = arith.addf %65, %66 : vector<8x16xf32>
    %c0_29 = arith.constant 0 : index
    %c1_30 = arith.constant 1 : index
    %c0_31 = arith.constant 0 : index
    %c0_32 = arith.constant 0 : index
    %68 = vector.load %arg7[%c0_29, %c1_30, %c0_31, %c0_32] : memref<1x3x8x16xf32, #tpu.memory_space<vmem>>, vector<1x1x8x16xf32>
    %69 = vector.shape_cast %68 : vector<1x1x8x16xf32> to vector<8x16xf32>
    %70 = vector.shape_cast %67 : vector<8x16xf32> to vector<1x1x8x16xf32>
    tpu.vector_store %arg7[%c0_29, %c1_30, %c0_31, %c0_32], %70 {strides = array<i32>} : memref<1x3x8x16xf32, #tpu.memory_space<vmem>>, vector<1x1x8x16xf32>,
    %71 = vector.broadcast %23 : f32 to vector<8x16xf32>
    %72 = arith.mulf %15, %71 : vector<8x16xf32>
    %73 = vector.broadcast %26 : f32 to vector<8x16xf32>
    %74 = arith.mulf %16, %73 : vector<8x16xf32>
    %75 = arith.addf %72, %74 : vector<8x16xf32>
    %76 = vector.broadcast %29 : f32 to vector<8x16xf32>
    %77 = arith.mulf %17, %76 : vector<8x16xf32>
    %78 = arith.addf %75, %77 : vector<8x16xf32>
    %79 = vector.broadcast %44 : f32 to vector<8x16xf32>
    %80 = arith.addf %78, %79 : vector<8x16xf32>
    %c0_33 = arith.constant 0 : index
    %c2_34 = arith.constant 2 : index
    %c0_35 = arith.constant 0 : index
    %c0_36 = arith.constant 0 : index
    %81 = vector.load %arg7[%c0_33, %c2_34, %c0_35, %c0_36] : memref<1x3x8x16xf32, #tpu.memory_space<vmem>>, vector<1x1x8x16xf32>
    %82 = vector.shape_cast %81 : vector<1x1x8x16xf32> to vector<8x16xf32>
    %83 = vector.shape_cast %80 : vector<8x16xf32> to vector<1x1x8x16xf32>
    tpu.vector_store %arg7[%c0_33, %c2_34, %c0_35, %c0_36], %83 {strides = array<i32>} : memref<1x3x8x16xf32, #tpu.memory_space<vmem>>, vector<1x1x8x16xf32>,
    return
  }
  func.func @transform_0(%arg0: i32, %arg1: i32, %arg2: i32) -> i32 {
    %c0_i32 = arith.constant 0 : i32
    %c0_i32_0 = arith.constant 0 : i32
    return %c0_i32 : i32
  }
  func.func @transform_1(%arg0: i32, %arg1: i32, %arg2: i32) -> (i32, i32) {
    %c0_i32 = arith.constant 0 : i32
    %c0_i32_0 = arith.constant 0 : i32
    %c0_i32_1 = arith.constant 0 : i32
    return %c0_i32, %c0_i32_0 : i32, i32
  }
  func.func @transform_2(%arg0: i32, %arg1: i32, %arg2: i32) -> (i32, i32) {
    %c0_i32 = arith.constant 0 : i32
    %c0_i32_0 = arith.constant 0 : i32
    %c0_i32_1 = arith.constant 0 : i32
    return %c0_i32, %c0_i32_0 : i32, i32
  }
  func.func @transform_3(%arg0: i32, %arg1: i32, %arg2: i32) -> (i32, i32, i32) {
    %c0_i32 = arith.constant 0 : i32
    return %arg0, %arg1, %arg2 : i32, i32, i32
  }
  func.func @transform_4(%arg0: i32, %arg1: i32, %arg2: i32) -> (i32, i32, i32, i32) {
    %c0_i32 = arith.constant 0 : i32
    %c0_i32_0 = arith.constant 0 : i32
    return %arg0, %c0_i32, %arg1, %arg2 : i32, i32, i32, i32
  }
}

</mosaic_0001>

<bundles_post_ra>
// kernel: ycbcr_to_rgb_jpeg.1
= control target key start
LH: loop header
LB: loop body
LE: loop exit
PB: predicated region body
PF: predicated region fallthrough
CT: control target
= control target key end

     0   :  { %s1222_s0 = inlined_call_operand.vmem [shape: f32[3], index: 0, kind: input, shape index: {}]   ;;  %s1223_s1 = inlined_call_operand.vmem [shape: f32[3,3], index: 1, kind: input, shape index: {}]   ;;  %s1224_s2 = inlined_call_operand.vmem [shape: bf16[48,48], index: 2, kind: input, shape index: {}]   ;;  %s1225_s3 = inlined_call_operand.vmem [shape: f32[2,16,48], index: 3, kind: input, shape index: {}]   ;;  %s1226_s4 = inlined_call_operand.hbm [shape: f32[2,3,16,16], index: 4, kind: output, shape index: {}]  }
   0x1   :  { %1240 = sst [smem:[#allocation20_spill]] %s1222_s0 }
   0x2   :  { %1241 = sst [smem:[#allocation21_spill]] %s1223_s1 }
   0x3   :  { %1242 = sst [smem:[#allocation22_spill]] %s1224_s2 }
   0x4   :  { %1243 = sst [smem:[#allocation23_spill]] %s1225_s3 }
   0x5   :  { %9 = vsyncpa [#allocation4], 0 }
   0x6   :  { %10 = vsyncpa [#allocation6], 0 }
   0x7   :  { %11 = vsyncpa [#allocation3], 0 }
   0x8   :  { %13 = vsyncpa [#allocation3 + $0x1], 0  ;;  %s990_s15 = smov 0   ;;  %s992_s16 = smov 0  }
   0x9   :  { %s994_s17 = smov 0   ;;  %s996_s18 = smov 0  }
   0xa   :  { %s998_s19 = smov 0   ;;  %s1000_s20 = smov 0  }
   0xb   :  { %s1002_s21 = smov 0   ;;  %s1004_s22 = smov 0  }
   0xc LB: > { %1244 = sst [smem:[#allocation11_spill]] %s925_s15  ;;  %s645_s23 = sadd.s32 4294967295, %s953_s22   ;;  %s953_s22 = sphi %s1004_s22, %s19_s22   ;;  %s949_s21 = sphi %s1002_s21, %s1274_s21   ;;  %s945_s20 = sphi %s1000_s20, %s1273_s20   ;;  %s941_s19 = sphi %s998_s19, %s1272_s19   ;;  %s937_s18 = sphi %s996_s18, %s1271_s18   ;;  %s933_s17 = sphi %s994_s17, %s1270_s17   ;;  %s929_s16 = sphi %s992_s16, %s1276_s16   ;;  %s925_s15 = sphi %s990_s15, %s1275_s15  }
   0xd   : > { %1245 = sst [smem:[#allocation12_spill]] %s933_s17  ;;  %s646_s24 = sadd.s32 4294967294, %s953_s22  }
   0xe   : > { %1246 = sst [smem:[#allocation13_spill]] %s945_s20  ;;  %s34_s25 = sadd.s32 1, %s945_s20 }
   0xf   : > { %1247 = sst [smem:[#allocation14_spill]] %s949_s21  ;;  %s38_s26 = sadd.s32 1, %s949_s21 }
  0x10   : > { %1248 = sst [smem:[#allocation15_spill]] %s953_s22  ;;  %p36_p0 = scmp.ge.s32.totalorder %s34_s25, 2 }
  0x11   : > { %s142_s27 = sadd.s32 1, %s933_s17  ;;  %p152_p1 = scmp.ne.s32.totalorder %s933_s17, %s929_s16 }
  0x12   : > { %p153_p2 = scmp.eq.s32.totalorder %s645_s23, 3  ;;  %s1278_s25 = smov (%p36_p0, %s34_s25), 0 }
  0x13   : > { %1249 = sst [smem:[#allocation16_spill]] %s1278_s25  ;;  %s1280_s26 = smov (!%p36_p0, %s38_s26), %s949_s21 }
  0x14   : > { %s136_s28 = ssub.s32 %s945_s20, %s1278_s25  ;;  %p1042_p3 = por %p153_p2, %p152_p1 }
  0x15   : > { %p40_p4 = scmp.ge.s32.totalorder %s1280_s26, 2  ;;  %p158_p5 = scmp.ne.s32.totalorder %s929_s16, %s925_s15 }
  0x16   : > { %s1250_s29 = scalar_select %p1042_p3, 1, 0 }
  0x17   : > { %p159_p6 = scmp.eq.s32.totalorder %s646_s24, 3  ;;  %p647_p7 = scmp.ge.s32.totalorder %s953_s22, 1 }
  0x18   : > { %s1282_s26 = smov (%p40_p4, %s1280_s26), 0  ;;  %p166_p9 = scmp.lt.s32.totalorder %s953_s22, 5 }
  0x19   : > { %1251 = sst [smem:[#allocation17_spill]] %s1282_s26  ;;  %p1051_p8 = por %p159_p6, %p158_p5 }
  0x1a   : > { %s135_s5 = ssub.s32 %s949_s21, %s1282_s26  ;;  %p1058_p10 = pnand %p647_p7, %p166_p9 }
  0x1b   : > { %s1252_s30 = scalar_select %p1051_p8, 1, 0 }
  0x1c   : > { %s137_s6 = sor.u32 %s136_s28, %s135_s5  ;;  %p1062_p12 = scmp.eq.s32.totalorder %s645_s23, 0 }
  0x1d   : > { %1253 = sst [smem:[#allocation18_spill]] %s1252_s30  ;;  %p140_p11 = scmp.eq.s32.totalorder %s137_s6, 0 }
  0x1e   : > { %s1254_s7 = scalar_select %p1058_p10, 1, 0 }
  0x1f   : > { %s1255_s8 = scalar_select %p1062_p12, 1, 0 }
  0x20   : > { %p731_p13 = pneg %p1058_p10  ;;  %s1256_s0 = sld [smem:[#allocation20_spill]] }
  0x21   : > { %s1072_s12 = scalar_select %p140_p11, %s933_s17, %s142_s27  }
  0x22   : > { %p1076_p0 = pnand %p1062_p12, %p731_p13  ;;  %s1259_s1 = sld [smem:[#allocation21_spill]] }
  0x23   : > { %1257 = sst [smem:[#allocation19_spill]] %s1072_s12 }
  0x24   : > { %p825_p2 = pneg %p1076_p0 }
  0x26   : > { %s179_s11 = sshll.u32 %s1256_s0, 4  ;;  %s180_s11 = int_to_ptr.vmem [resolvable:$true] %s179_s11 }
  0x27   : > { %s823_s28 = scalar_lea.vmem %s180_s11, 16  ;;  %p831_p6 = scmp.lt.s32.totalorder %s180_s11, %s180_s11 }
  0x28   : > { %s190_s24 = sshll.u32 %s1259_s1, 4  ;;  %p824_p1 = scmp.ne.s32.totalorder %s180_s11, %s823_s28  ;;  %s191_s24 = int_to_ptr.vmem [resolvable:$true] %s190_s24 }
  0x29   : > { %p832_p7 = scmp.lt.s32.totalorder %s823_s28, %s823_s28 }
  0x2a   : > { %p826_p4 = pnand %p825_p2, %p824_p1 }
  0x2b   : > { %p833_p9 = por %p832_p7, %p831_p6 }
  0x2c   : > { %p827_p5 = pneg %p826_p4 }
  0x2e   : > { %p834_p11 = pnand %p833_p9, %p827_p5 }
  0x30   : > { %837 = shalt.err (!%p834_p11)
}
  0x31   : > { %s955_s27 = smov [#allocation2]   ;;  %s838_s5 = scalar_lea.vmem %s191_s24, 64 }
  0x32   : > { %734 = dma.vmem_to_smem (!%p1076_p0), %s180_s11, 16, %s955_s27, [#allocation4]  }
  0x33   : > { %p839_p13 = scmp.ne.s32.totalorder %s191_s24, %s838_s5  ;;  %p846_p12 = scmp.lt.s32.totalorder %s191_s24, %s191_s24 }
  0x34   : > { %p847_p10 = scmp.lt.s32.totalorder %s838_s5, %s838_s5 }
  0x35   : > { %p841_p8 = pnand %p839_p13, %p825_p2 }
  0x36   : > { %p848_p1 = por %p847_p10, %p846_p12 }
  0x37   : > { %p842_p3 = pneg %p841_p8 }
  0x39   : > { %p849_p4 = pnand %p848_p1, %p842_p3 }
  0x3b   : > { %852 = shalt.err (!%p849_p4)
}
  0x3c   : > { %s956_s6 = smov [#allocation5]   ;;  %p1260_p5 = scmp.ne.s32.totalorder %s1254_s7, 0 }
  0x3d   : > { %737 = dma.vmem_to_smem (!%p1076_p0), %s191_s24, 64, %s956_s6, [#allocation6]  }
  0x3e   : > { %220 = sbr.rel (%p1260_p5) target bundleno = 441 (0x1b9), region = 36  ;;  %p1261_p6 = scmp.ne.s32.totalorder (!%p1260_p5), %s1255_s8, 0 }
  0x43   : > { %912 = dma.done.wait (%p1261_p6), [#allocation4], 16  }
  0x44   : > { %914 = vsyncadd (%p1261_p6), [#allocation4], 4294967280 }
  0x45   : > { %916 = dma.done.wait (%p1261_p6), [#allocation6], 64  }
  0x46   : > { %918 = vsyncadd (%p1261_p6), [#allocation6], 4294967232 }
  0x47   : > { %230 = sfence }
  0x48   : > { %s1262_s2 = sld [smem:[#allocation22_spill]]  ;;  %v957_v1 = vmov 0.0   ;;  %p257_p3 = scmp.lt.s32.totalorder %s941_s19, 1  ;;  %vm958_vm0 = vmmov 0   ;;  %vm301_vm1 = vcmask 392192   ;;  %vm477_vm2 = vcmask 130048  }
  0x49   : > { %689 = vmatprep.subr.bf16.mxu0 %v957_v1  ;;  %699 = vmatprep.subr.bf16.mxu1 %v957_v1  ;;  %p259_p8 = scmp.lt.s32.totalorder %s937_s18, 1  ;;  %s1263_s3 = sld [smem:[#allocation23_spill]] }
  0x4a   : > { %695 = vmatprep.mubr.msk.bf16.mxu0 %vm958_vm0, %v957_v1  ;;  %705 = vmatprep.mubr.msk.bf16.mxu1 %vm958_vm0, %v957_v1  ;;  %s258_s8 = scalar_select %p257_p3, %s941_s19, 1 }
  0x4b   : > { %s260_s13 = scalar_select %p259_p8, %s937_s18, 1 }
  0x4c   : > { %s654_s24 = sshll.u32 %s258_s8, 1  ;;  %s1121_s10 = sld [smem:[#allocation5 + $0x82]] }
  0x4d   : > { %s265_s28 = sadd.s32 %s654_s24, %s260_s13  ;;  %s1123_s7 = sld [smem:[#allocation5 + $0x80]] }
  0x4e   : > { %v820_v0 = vld [vmem:[%s1262_s2 + $0x10] sm:$0xff]   ;;  %v821_v2 = vld [vmem:[%s1262_s2 + $0x8] sm:$0xff]   ;;  %v822_v3 = vld [vmem:[%s1262_s2] sm:$0xff]   ;;  %s655_s27 = sshll.u32 %s265_s28, 3  ;;  %s1125_s11 = sld [smem:[#allocation5 + $0x100]] }
  0x4f   : > { %690 = vmatpush3.bf16.msra.mxu0 %v820_v0  ;;  %700 = vmatpush3.bf16.msra.mxu1 %v820_v0  ;;  %s267_s9 = scalar_lea.vmem %s1263_s3, %s655_s27  ;;  %s1127_s8 = sld [smem:[#allocation5 + $0x81]] }
  0x50   : > { %691 = vmatprep.subr.bf16.mxu0 %v957_v1  ;;  %701 = vmatprep.subr.bf16.mxu1 %v957_v1  ;;  %v269_v4 = vld [vmem:[%s267_s9] sm:$0xff]  ;;  %s1129_s13 = sld [smem:[#allocation5 + $0x102]]  ;;  %s959_s23 = smov 112  }
  0x51   : > { %v276_v5 = vpack.c.bf16 %v269_v4, %v269_v4  ;;  %s1133_s14 = sld [smem:[#allocation5 + $0x101]]  ;;  %s960_s24 = smov 96  }
  0x52   : > { %v501_v22 = vstv %s1121_s10  ;;  %s432_s28 = sld [smem:[#allocation2]]  ;;  %s254_s25 = sand.u32 1, %s929_s16  }
  0x53   : > { %692 = vmatpush3.bf16.msra.mxu0 %v821_v2  ;;  %702 = vmatpush3.bf16.msra.mxu1 %v821_v2  ;;  %v277_v6 = vunpack.c.l.bf16 %v276_v5  ;;  %v461_v23 = vstv %s1123_s7  ;;  %s662_s27 = sld [smem:[#allocation2 + $0x1]]  ;;  %s719_s17 = smul.u32 24, %s254_s25 }
  0x54   : > { %693 = vmatprep.subr.bf16.mxu0 %v957_v1  ;;  %703 = vmatprep.subr.bf16.mxu1 %v957_v1  ;;  %v468_v29 = vstv %s1125_s11  ;;  %s435_s5 = sld [smem:[#allocation5]]  ;;  %p1264_p12 = scmp.ne.s32.totalorder %s1250_s29, 0 }
  0x55   : > { %v278_v7 = vsub.f32 %v269_v4, %v277_v6  ;;  %v481_v30 = vstv %s1127_s8  ;;  %s1139_s6 = sld [smem:[#allocation2 + $0x2]] }
  0x56   : > { %v508_v34 = vstv %s1129_s13  ;;  %s1141_s9 = sld [smem:[#allocation5 + $0x2]] }
  0x57   : > { %694 = vmatpush3.bf16.msra.mxu0 %v822_v3  ;;  %704 = vmatpush3.bf16.msra.mxu1 %v822_v3  ;;  %v279_v8 = vpack.c.bf16 %v278_v7, %v278_v7  ;;  %v488_v35 = vstv %s1133_s14  ;;  %s664_s0 = sld [smem:[#allocation5 + $0x1]] }
  0x58   : > { %709 = vmatprep.subr.bf16.mxu0 %v957_v1 }
  0x59   : > { %v280_v9 = vunpack.c.l.bf16 %v279_v8  ;;  %s445_s1 = smul.f32 %s1123_s7, %s662_s27 }
  0x5a   : > { %706 = vmatmul.mubr.msk.bf16.vlgmr.msra.gmra.mxu1 %vm301_vm1, %v276_v5  ;;  %696 = vmatmul.mubr.msk.bf16.vlgmr.msra.gmra.mxu0 %vm301_vm1, %v279_v8  ;;  %s455_s26 = smul.f32 %s1121_s10, %s662_s27  ;;  %v459_v38 = vstv %s435_s5 }
  0x5b   : > { %710 = vmatpush3.bf16.msra.mxu0 %v820_v0  ;;  %715 = vmatprep.mubr.msk.bf16.mxu0 %vm958_vm0, %v957_v1  ;;  %v281_v10 = vsub.f32 %v278_v7, %v280_v9  ;;  %s447_s2 = smul.f32 %s1125_s11, %s1139_s6 }
  0x5c   : > { %711 = vmatprep.subr.bf16.mxu0 %v957_v1  ;;  %s454_s3 = smul.f32 %s1141_s9, %s432_s28  ;;  %v499_v42 = vstv %s1141_s9 }
  0x5d   : > { %v282_v11 = vpack.c.bf16 %v281_v10, %v281_v10  ;;  %s449_s21 = smul.f32 %s664_s0, %s432_s28  ;;  %v479_v43 = vstv %s664_s0 }
  0x5e   : > { %s450_s20 = smul.f32 %s1127_s8, %s662_s27  ;;  %s456_s30 = sadd.f32 %s455_s26, %s454_s3 }
  0x5f   : > { %712 = vmatpush3.bf16.msra.mxu0 %v821_v2  ;;  %s457_s15 = smul.f32 %s1129_s13, %s1139_s6  ;;  %s256_s3 = scalar_lea.vmem [#allocation7], %s719_s17 }
  0x60   : > { %713 = vmatprep.subr.bf16.mxu0 %v957_v1  ;;  %s451_s7 = sadd.f32 %s450_s20, %s449_s21  ;;  %s452_s22 = smul.f32 %s1133_s14, %s1139_s6 }
  0x61   : > { %s720_s11 = smul.u32 6, %s941_s19  ;;  %s535_s26 = sshll.u32 %s256_s3, 4  ;;  %s1160_s26 = int_to_ptr.vmem [resolvable:$true] %s535_s26 }
  0x62   : > { %s453_s10 = sadd.f32 %s452_s22, %s451_s7  ;;  %s1171_s19 = scalar_lea.sflag [#allocation3], %s254_s25 }
  0x63   : > { %714 = vmatpush3.bf16.msra.mxu0 %v822_v3  ;;  %s853_s20 = scalar_lea.vmem %s1160_s26, 384  ;;  %s961_s21 = smov [#allocation7]  }
  0x64   : > { %v495_v56 = vstv %s453_s10  ;;  %p854_p10 = scmp.ne.s32.totalorder %s1160_s26, %s853_s20  ;;  %s857_s22 = sshll.u32 %s961_s21, 4  ;;  %s858_s22 = int_to_ptr.vmem [resolvable:$false] %s857_s22 }
  0x65   : > { %p860_p7 = scmp.lt.s32.totalorder %s1160_s26, %s858_s22 }
  0x66   : > { %716 = vmatmul.mubr.msk.bf16.vlgmr.msra.gmra.mxu0 %vm301_vm1, %v282_v11  ;;  %p855_p0 = pnand %p854_p10, %p1264_p12 }
  0x68   : > { %p856_p2 = pneg %p855_p0 }
 0x11a   : > { %v382_v12 = vpop.f32.mrf.mxu1  ;;  %v339_v15 = vpop.f32.mrf.mxu0 }
 0x11b   : > { %v383_v20 = vadd.f32 %v382_v12, %v339_v15 }
 0x11c   : > { %v707_v13 = vpop.f32.mrf.mxu1  ;;  %v697_v17 = vpop.f32.mrf.mxu0 }
 0x11e   : > { %v385_v14 = vpop.f32.mrf.mxu1  ;;  %v342_v18 = vpop.f32.mrf.mxu0 }
 0x120   : > { %v708_v16 = vpop.f32.mrf.mxu1  ;;  %v698_v19 = vpop.f32.mrf.mxu0 }
 0x126   : > { %v425_v21 = vpop.f32.mrf.mxu0 }
 0x127   : > { %v431_v24 = vadd.f32 %v425_v21, %v383_v20 }
 0x128   : > { %v717_v25 = vpop.f32.mrf.mxu0 }
 0x129   : > { %v502_v26 = vmul.f32 %v501_v22, %v431_v24  ;;  %v462_v27 = vmul.f32 %v461_v23, %v431_v24  ;;  %v469_v32 = vmul.f32 %v468_v29, %v431_v24  ;;  %v482_v33 = vmul.f32 %v481_v30, %v431_v24 }
 0x12a   : > { %v428_v28 = vpop.f32.mrf.mxu0  ;;  %v509_v36 = vmul.f32 %v508_v34, %v431_v24  ;;  %v489_v37 = vmul.f32 %v488_v35, %v431_v24  ;;  %v460_v41 = vmul.f32 %v459_v38, %v431_v24  ;;  %v500_v48 = vmul.f32 %v499_v42, %v431_v24 }
 0x12b   : > { %504 = vrot.lane.b32.xlu1 %v502_v26, %s959_s23  ;;  %464 = vrot.lane.b32.xlu0 %v462_v27, %s959_s23  ;;  %v480_v50 = vmul.f32 %v479_v43, %v431_v24 }
 0x12c   : > { %v718_v31 = vpop.f32.mrf.mxu0 }
 0x12f   : > { %471 = vrot.lane.b32.xlu1 %v469_v32, %s960_s24  ;;  %484 = vrot.lane.b32.xlu0 %v482_v33, %s959_s23  ;;  %s444_s23 = smul.f32 %s435_s5, %s432_s28 }
 0x133   : > { %511 = vrot.lane.b32.xlu1 %v509_v36, %s960_s24  ;;  %491 = vrot.lane.b32.xlu0 %v489_v37, %s960_s24  ;;  %s446_s24 = sadd.f32 %s445_s1, %s444_s23 }
 0x134   : > { %s458_s1 = sadd.f32 %s457_s15, %s456_s30  ;;  %s859_s30 = scalar_lea.vmem %s858_s22, 768 }
 0x135   : > { %s448_s12 = sadd.f32 %s447_s2, %s446_s24  ;;  %s532_s2 = sadd.s32 %s937_s18, %s720_s11 }
 0x136   : > { %v515_v54 = vstv %s458_s1  ;;  %s674_s0 = sshll.u32 %s532_s2, 7  ;;  %p861_p9 = scmp.lt.s32.totalorder %s859_s30, %s853_s20 }
 0x137   : > { %v475_v45 = vstv %s448_s12  ;;  %s1165_s18 = scalar_lea.hbm %s1226_s4, %s674_s0 }
 0x138   : > { %p862_p11 = por %p861_p9, %p860_p7 }
 0x13a   : > { %p863_p13 = pnand %p862_p11, %p856_p2 }
 0x19d   : > { %v505_v39 = vpop.permute.xlu1 %504  ;;  %v465_v40 = vpop.permute.xlu0 %464 }
 0x19e   : > { %v467_v44 = vadd.f32 %v465_v40, %v460_v41  ;;  %v507_v51 = vadd.f32 %v505_v39, %v500_v48 }
 0x1a1   : > { %v472_v46 = vpop.permute.xlu1 %471  ;;  %v485_v47 = vpop.permute.xlu0 %484 }
 0x1a2   : > { %v474_v49 = vadd.f32 %v472_v46, %v467_v44  ;;  %v487_v53 = vadd.f32 %v485_v47, %v480_v50 }
 0x1a4   : > { %v476_v52 = vadd.f32 %v475_v45, %v474_v49 }
 0x1a5   : > { %v512_v55 = vpop.permute.xlu1 %511  ;;  %v492_v57 = vpop.permute.xlu0 %491 }
 0x1a6   : > { %478 = vst.msk [vmem:[%s256_s3] sm:$0xff] %vm477_vm2, %v476_v52  ;;  %v514_v58 = vadd.f32 %v512_v55, %v507_v51  ;;  %v494_v59 = vadd.f32 %v492_v57, %v487_v53 }
 0x1a8   : > { %v516_v60 = vadd.f32 %v515_v54, %v514_v58  ;;  %v496_v61 = vadd.f32 %v495_v56, %v494_v59 }
 0x1aa   : > { %673 = vst.msk [vmem:[%s256_s3 + $0x10] sm:$0xff] %vm477_vm2, %v516_v60  ;;  %672 = vst.msk [vmem:[%s256_s3 + $0x8] sm:$0xff] %vm477_vm2, %v496_v61 }
 0x1ab   : > { %866 = shalt.err (!%p863_p13)
}
 0x1ac   : > { %s867_s25 = scalar_lea.hbm %s1165_s18, 384  ;;  %s871_s13 = scalar_lea.hbm %s1226_s4, 1536 }
 0x1ad   : > { %p868_p1 = scmp.ne.s32.totalorder %s1165_s18, %s867_s25  ;;  %p872_p6 = scmp.lt.s32.totalorder %s1165_s18, %s1226_s4 }
 0x1ae   : > { %p873_p3 = scmp.lt.s32.totalorder %s871_s13, %s867_s25 }
 0x1af   : > { %p869_p4 = pnand %p868_p1, %p1264_p12 }
 0x1b0   : > { %p874_p8 = por %p873_p3, %p872_p6 }
 0x1b1   : > { %p870_p5 = pneg %p869_p4 }
 0x1b3   : > { %p875_p10 = pnand %p874_p8, %p870_p5 }
 0x1b5   : > { %878 = shalt.err (!%p875_p10)
}
 0x1b6   : > { %s962_s27 = smov 128   ;;  %s963_s5 = smov 256  }
 0x1b7   : > { %s964_s6 = smov 8  }
 0x1b8   : > { %729 = dma.vmem_to_hbm [thread:$0]  (%p1264_p12), %s1160_s26, 384, %s1165_s18, %s1171_s19, %s962_s27, %s963_s5, %s964_s6  }
 0x1b9 PF: > { %s1265_s9 = sld [smem:[#allocation15_spill]] }
 0x1ba   : > { %s1266_s23 = sld [smem:[#allocation11_spill]] }
 0x1bb   : > { %s1267_s24 = sld [smem:[#allocation18_spill]] }
 0x1bf   : > { %p746_p0 = scmp.ge.s32.totalorder %s1265_s9, 2 }
 0x1c0   : > { %s550_s7 = sand.u32 1, %s1266_s23  }
 0x1c1   : > { %p1268_p2 = scmp.ne.s32.totalorder %s1267_s24, 0  ;;  %s551_s11 = scalar_lea.sflag [#allocation3], %s550_s7 }
 0x1c3   : > { %p739_p7 = pnand %p746_p0, %p1268_p2 }
 0x1c5   : > { %p740_p9 = pneg %p739_p7 }
 0x1c7   : > { %920 = dma.done.wait (%p740_p9), %s551_s11, 384  }
 0x1c8   : > { %922 = vsyncadd (%p740_p9), %s551_s11, 4294966912  ;;  %s19_s22 = sadd.s32 1, %s1265_s9   ;;  %s1269_s1 = sld [smem:[#allocation12_spill]] }
 0x1c9   : > { %p16_p11 = scmp.ge.s32.totalorder %s19_s22, 6   ;;  %s1270_s17 = sld [smem:[#allocation19_spill]] }
 0x1ca   : > { %s1271_s18 = sld [smem:[#allocation13_spill]]  ;;  %s1275_s15 = smov %s929_s16 }
 0x1cb   : > { %s1272_s19 = sld [smem:[#allocation14_spill]]  ;;  %18 = sbr.rel (!%p16_p11) target bundleno = 12 (0xc), region = 82 }
 0x1cc   : > { %s1273_s20 = sld [smem:[#allocation16_spill]] }
 0x1cd   : > { %s1274_s21 = sld [smem:[#allocation17_spill]] }
 0x1ce   : > { %s1276_s16 = smov %s1269_s1 }
 0x1d0   :  { %556 = vsyncpa [#allocation3], 1 }
 0x1d1   :  { %558 = vsyncpa [#allocation3 + $0x1], 1 }
 0x1d2   :  { %559 = vsyncpa [#allocation4], 1 }
 0x1d3   :  { %561 = vsyncpa [#allocation4 + $0x1], 1 }
 0x1d4   :  { %562 = vsyncpa [#allocation6], 1 }

</bundles_post_ra>
